<compile_context>
chip_gen: v7x
topology: tpu7x:2x2x1
jax: 0.10.0
libtpu: 0.0.40
codegen_flags: <defaults>
</compile_context>

<pallas_src>
import functools

import jax
import jax.numpy as jnp
from jax import lax
from jax.experimental import pallas as pl
from jax.experimental.pallas import tpu as pltpu

NUM_GROUPS = 4
EPS = 1e-5  # nn.GroupNorm default


def _vmem_capacity_bytes():
    """Per-generation VMEM capacity; falls back to the smallest (v7x, 64 MiB)."""
    try:
        info = pltpu.get_tpu_info()
        cap = getattr(info, "vmem_capacity_bytes", None)
        if cap:
            return int(cap)
    except Exception:
        pass
    return 64 << 20


def _rowsum(t):
    """(Nb, R, S) -> (Nb, 1, 1) sum.

    Lane (XLU) reduce over S, then a pairwise tree of static single-sublane
    slices over R.  No MXU, no lane<->sublane relayout of the stats.
    """
    s = jnp.sum(t, axis=-1, keepdims=True)                     # (Nb, R, 1)
    parts = [s[:, r:r + 1, :] for r in range(s.shape[1])]
    while len(parts) > 1:
        nxt = [parts[i] + parts[i + 1] for i in range(0, len(parts) - 1, 2)]
        if len(parts) % 2:
            nxt.append(parts[-1])
        parts = nxt
    return parts[0]


def _gating_kernel(x_ref, wt_ref, p_ref, o_ref, *, nb, cin, cout, cpg,
                   groups, use_mxu, mxu_bf16, inv_n):
    # x_ref: (Nb, Cin, S)  channels on sublanes, spatial on lanes
    # wt_ref: (Cout, Cin)  f32
    # p_ref: (Cout, 3)     [:,0]=conv bias, [:,1]=gamma, [:,2]=beta
    # o_ref: (Nb, Cout, S)
    x = x_ref[...]
    wt = wt_ref[...]
    bias = p_ref[:, 0:1]                                        # (Cout, 1)
    gamma = p_ref[:, 1:2]
    beta = p_ref[:, 2:3]

    # ---- 1x1x1 Conv3d == per-sample channel mix ---------------------------
    if use_mxu:
        cdt = jnp.bfloat16 if mxu_bf16 else jnp.float32
        wb = jnp.broadcast_to(wt.astype(cdt)[None], (nb, cout, cin))
        y = jnp.einsum("boc,bcs->bos", wb, x.astype(cdt),
                       preferred_element_type=jnp.float32)      # (Nb, Cout, S)
        y = y + bias[None]
    else:
        # Tiny channel counts: Cin broadcast-FMAs on the VPU, 4-way ILP tree.
        xf = x.astype(jnp.float32)
        n_acc = min(4, cin)
        accs = [None] * n_acc
        for k in range(cin):
            t = wt[:, k:k + 1][None] * xf[:, k:k + 1, :]        # (Nb, Cout, S)
            j = k % n_acc
            accs[j] = t if accs[j] is None else accs[j] + t
        while len(accs) > 1:
            nxt = [accs[i] + accs[i + 1] for i in range(0, len(accs) - 1, 2)]
            if len(accs) % 2:
                nxt.append(accs[-1])
            accs = nxt
        y = accs[0] + bias[None]

    # ---- GroupNorm(groups) + ReLU (per-sample stats, subtract-mean var) ---
    for g in range(groups):
        lo = g * cpg
        yg = y[:, lo:lo + cpg, :]                               # (Nb, cpg, S)
        mean = _rowsum(yg) * inv_n                              # (Nb, 1, 1)
        c = yg - mean
        var = _rowsum(c * c) * inv_n
        scale = gamma[lo:lo + cpg, :][None] * lax.rsqrt(var + EPS)
        og = jnp.maximum(c * scale + beta[lo:lo + cpg, :][None], 0.0)
        o_ref[:, lo:lo + cpg, :] = og.astype(o_ref.dtype)       # lane-dense store


@functools.partial(jax.jit, static_argnames=("mxu_bf16",))
def unet_grid_gating_signal(x_ncdhw, w, b, gamma, beta, mxu_bf16=True):
    """x_ncdhw: (N, Cin, D, H, W); w: (Cin, Cout); b/gamma/beta: (Cout,)."""
    N, Cin, D, H, W = x_ncdhw.shape
    Cout = w.shape[1]
    assert Cout % NUM_GROUPS == 0, "out_ch must be divisible by 4 groups"
    S = D * H * W
    cpg = Cout // NUM_GROUPS

    # Free reshapes only (contiguous trailing dims) -- no transposes of x.
    x = x_ncdhw.reshape(N, Cin, S)
    wt = jnp.transpose(w).astype(jnp.float32)                   # (Cout, Cin)
    params = jnp.stack([b, gamma, beta], axis=1).astype(jnp.float32)  # (Cout, 3)

    use_mxu = (Cin >= 32) and (Cout >= 16)

    # ---- Per-generation VMEM budget & batch-per-step (Nb) selection -------
    budget = (_vmem_capacity_bytes() * 3) // 4        # ~48 MiB v7x, ~96 MiB v5e/v6e
    headroom = 4 << 20
    in_b = x_ncdhw.dtype.itemsize
    per_sample = (2 * Cin * S * in_b + 2 * Cout * S * in_b      # dbl-buffered in/out
                  + 4 * S * (Cin + 6 * Cout))                   # f32 compute temps
    param_bytes = 2 * 4 * (Cout * Cin + 3 * Cout)
    avail = budget - param_bytes - headroom
    if per_sample > avail:
        # TODO(synk): tile S in the grid with a two-pass GroupNorm (partial
        # sum/sumsq per S-tile combined in SMEM) instead of failing.
        raise NotImplementedError(
            f"single-sample block ({per_sample} B) exceeds the VMEM budget "
            f"({avail} B); S-tiled two-pass GroupNorm not implemented yet")
    nb_fit = max(1, avail // per_sample)
    cap = nb_fit
    if N >= 2:
        cap = min(cap, max(1, N // 2))   # keep >=2 grid steps so both v7x TCs get work
    nb = 1
    for d in range(1, N + 1):            # largest divisor of N within the cap
        if N % d == 0 and d <= cap:
            nb = d
    steps = N // nb

    kernel = functools.partial(
        _gating_kernel, nb=nb, cin=Cin, cout=Cout, cpg=cpg, groups=NUM_GROUPS,
        use_mxu=use_mxu, mxu_bf16=bool(mxu_bf16), inv_n=1.0 / float(S * cpg))

    out = pl.pallas_call(
        kernel,
        out_shape=jax.ShapeDtypeStruct((N, Cout, S), x_ncdhw.dtype),
        grid_spec=pltpu.PrefetchScalarGridSpec(
            num_scalar_prefetch=0,
            grid=(steps,),
            in_specs=[
                pl.BlockSpec((nb, Cin, S), lambda n: (n, 0, 0)),
                pl.BlockSpec((Cout, Cin), lambda n: (0, 0)),
                pl.BlockSpec((Cout, 3), lambda n: (0, 0)),
            ],
            out_specs=pl.BlockSpec((nb, Cout, S), lambda n: (n, 0, 0)),
        ),
        compiler_params=pltpu.CompilerParams(
            dimension_semantics=("parallel",),
            vmem_limit_bytes=int(budget),
        ),
    )(x, wt, params)

    # Free reshape back to NCDHW (already channels-major).
    return out.reshape(N, Cout, D, H, W)


def _reference(x_ncdhw, w, b, gamma, beta):
    """Pure-JAX reference (matches PyTorch Conv3d(1x1x1)+GroupNorm(4)+ReLU)."""
    N, Cin, D, H, W = x_ncdhw.shape
    Cout = w.shape[1]
    x = x_ncdhw.reshape(N, Cin, -1)                               # (N, Cin, S)
    y = jnp.einsum("oc,ncs->nos", w.T, x) + b[None, :, None]      # (N, Cout, S)
    yg = y.reshape(N, NUM_GROUPS, -1)                             # (N, G, cpg*S)
    mean = yg.mean(axis=2, keepdims=True)
    var = yg.var(axis=2, keepdims=True)
    yn = ((yg - mean) / jnp.sqrt(var + EPS)).reshape(N, Cout, -1)
    out = jnp.maximum(yn * gamma[None, :, None] + beta[None, :, None], 0.0)
    return out.reshape(N, Cout, D, H, W)


if __name__ == "__main__":
    key = jax.random.PRNGKey(0)
    k_x, k_w, k_b, k_g, k_be, k_x2, k_w2 = jax.random.split(key, 7)

    # --- Config 1: tiny channels -> VPU conv path, Nb=2 batching (N=4 -> 2 steps)
    N, Cin, Cout = 4, 4, 8
    D = H = W = 4                                   # S = 64
    x = jax.random.normal(k_x, (N, Cin, D, H, W), dtype=jnp.float32)
    w = jax.random.normal(k_w, (Cin, Cout), dtype=jnp.float32) * (1.0 / Cin ** 0.5)
    b = 0.1 * jax.random.normal(k_b, (Cout,), dtype=jnp.float32)
    gamma = 1.0 + 0.1 * jax.random.normal(k_g, (Cout,), dtype=jnp.float32)
    beta = 0.1 * jax.random.normal(k_be, (Cout,), dtype=jnp.float32)

    out = jax.block_until_ready(unet_grid_gating_signal(x, w, b, gamma, beta))
    ref = _reference(x, w, b, gamma, beta)
    assert out.shape == (N, Cout, D, H, W)
    assert jnp.allclose(out, ref, atol=1e-4, rtol=1e-4), "VPU path mismatch"

    # --- Config 2: larger channels -> MXU conv path (bf16 inputs, f32 accumulate)
    N2, Cin2, Cout2 = 2, 64, 16
    x2 = jax.random.normal(k_x2, (N2, Cin2, D, H, W), dtype=jnp.float32)
    w2 = jax.random.normal(k_w2, (Cin2, Cout2), dtype=jnp.float32) * (1.0 / Cin2 ** 0.5)
    b2 = 0.1 * jax.random.normal(k_b, (Cout2,), dtype=jnp.float32)
    g2 = 1.0 + 0.1 * jax.random.normal(k_g, (Cout2,), dtype=jnp.float32)
    be2 = 0.1 * jax.random.normal(k_be, (Cout2,), dtype=jnp.float32)

    out2 = jax.block_until_ready(
        unet_grid_gating_signal(x2, w2, b2, g2, be2, mxu_bf16=True))
    ref2 = _reference(x2, w2, b2, g2, be2)
    assert out2.shape == (N2, Cout2, D, H, W)
    assert jnp.allclose(out2, ref2, atol=5e-2, rtol=5e-2), "MXU path mismatch"

    print("KERNEL_OK")
</pallas_src>

<mosaic_0001>
module attributes {stable_mosaic.version = 11 : i64} {
  func.func @_gating_kernel(%arg0: i32, %arg1: memref<2x4x64xf32, #tpu.memory_space<vmem>>, %arg2: memref<8x4xf32, #tpu.memory_space<vmem>>, %arg3: memref<8x3xf32, #tpu.memory_space<vmem>>, %arg4: memref<2x8x64xf32, #tpu.memory_space<vmem>>) attributes {dimension_semantics = [#tpu.dimension_semantics<parallel>], iteration_bounds = array<i64: 2>, scalar_prefetch = 0 : i64, scratch_operands = 0 : i64, tpu.core_type = #tpu.core_type<tc>, window_params = [{transform_indices = @transform_0, window_bounds = array<i64: 2, 4, 64>}, {pipeline_mode = #tpu.pipeline_mode<synchronous>, transform_indices = @transform_1, window_bounds = array<i64: 8, 4>}, {pipeline_mode = #tpu.pipeline_mode<synchronous>, transform_indices = @transform_2, window_bounds = array<i64: 8, 3>}, {transform_indices = @transform_3, window_bounds = array<i64: 2, 8, 64>}]} {
    %c0 = arith.constant 0 : index
    %c0_0 = arith.constant 0 : index
    %c0_1 = arith.constant 0 : index
    %0 = vector.load %arg1[%c0, %c0_0, %c0_1] : memref<2x4x64xf32, #tpu.memory_space<vmem>>, vector<2x4x64xf32>
    %c0_2 = arith.constant 0 : index
    %c0_3 = arith.constant 0 : index
    %1 = vector.load %arg2[%c0_2, %c0_3] : memref<8x4xf32, #tpu.memory_space<vmem>>, vector<8x4xf32>
    %c0_4 = arith.constant 0 : index
    %c0_5 = arith.constant 0 : index
    %2 = vector.load %arg3[%c0_4, %c0_5] : memref<8x3xf32, #tpu.memory_space<vmem>>, vector<8x1xf32>
    %c0_6 = arith.constant 0 : index
    %c1 = arith.constant 1 : index
    %3 = vector.load %arg3[%c0_6, %c1] : memref<8x3xf32, #tpu.memory_space<vmem>>, vector<8x1xf32>
    %c0_7 = arith.constant 0 : index
    %c2 = arith.constant 2 : index
    %4 = vector.load %arg3[%c0_7, %c2] : memref<8x3xf32, #tpu.memory_space<vmem>>, vector<8x1xf32>
    %5 = vector.extract_strided_slice %1 {offsets = [0, 0], sizes = [8, 1], strides = [1, 1]} : vector<8x4xf32> to vector<8x1xf32>
    %6 = vector.shape_cast %5 : vector<8x1xf32> to vector<1x8x1xf32>
    %7 = vector.extract_strided_slice %0 {offsets = [0, 0, 0], sizes = [2, 1, 64], strides = [1, 1, 1]} : vector<2x4x64xf32> to vector<2x1x64xf32>
    %8 = vector.broadcast %6 : vector<1x8x1xf32> to vector<2x8x64xf32>
    %9 = vector.broadcast %7 : vector<2x1x64xf32> to vector<2x8x64xf32>
    %10 = arith.mulf %8, %9 : vector<2x8x64xf32>
    %11 = vector.extract_strided_slice %1 {offsets = [0, 1], sizes = [8, 1], strides = [1, 1]} : vector<8x4xf32> to vector<8x1xf32>
    %12 = vector.shape_cast %11 : vector<8x1xf32> to vector<1x8x1xf32>
    %13 = vector.extract_strided_slice %0 {offsets = [0, 1, 0], sizes = [2, 1, 64], strides = [1, 1, 1]} : vector<2x4x64xf32> to vector<2x1x64xf32>
    %14 = vector.broadcast %12 : vector<1x8x1xf32> to vector<2x8x64xf32>
    %15 = vector.broadcast %13 : vector<2x1x64xf32> to vector<2x8x64xf32>
    %16 = arith.mulf %14, %15 : vector<2x8x64xf32>
    %17 = vector.extract_strided_slice %1 {offsets = [0, 2], sizes = [8, 1], strides = [1, 1]} : vector<8x4xf32> to vector<8x1xf32>
    %18 = vector.shape_cast %17 : vector<8x1xf32> to vector<1x8x1xf32>
    %19 = vector.extract_strided_slice %0 {offsets = [0, 2, 0], sizes = [2, 1, 64], strides = [1, 1, 1]} : vector<2x4x64xf32> to vector<2x1x64xf32>
    %20 = vector.broadcast %18 : vector<1x8x1xf32> to vector<2x8x64xf32>
    %21 = vector.broadcast %19 : vector<2x1x64xf32> to vector<2x8x64xf32>
    %22 = arith.mulf %20, %21 : vector<2x8x64xf32>
    %23 = vector.extract_strided_slice %1 {offsets = [0, 3], sizes = [8, 1], strides = [1, 1]} : vector<8x4xf32> to vector<8x1xf32>
    %24 = vector.shape_cast %23 : vector<8x1xf32> to vector<1x8x1xf32>
    %25 = vector.extract_strided_slice %0 {offsets = [0, 3, 0], sizes = [2, 1, 64], strides = [1, 1, 1]} : vector<2x4x64xf32> to vector<2x1x64xf32>
    %26 = vector.broadcast %24 : vector<1x8x1xf32> to vector<2x8x64xf32>
    %27 = vector.broadcast %25 : vector<2x1x64xf32> to vector<2x8x64xf32>
    %28 = arith.mulf %26, %27 : vector<2x8x64xf32>
    %29 = arith.addf %10, %16 : vector<2x8x64xf32>
    %30 = arith.addf %22, %28 : vector<2x8x64xf32>
    %31 = arith.addf %29, %30 : vector<2x8x64xf32>
    %32 = vector.shape_cast %2 : vector<8x1xf32> to vector<1x8x1xf32>
    %33 = vector.broadcast %32 : vector<1x8x1xf32> to vector<2x8x64xf32>
    %34 = arith.addf %31, %33 : vector<2x8x64xf32>
    %35 = vector.extract_strided_slice %34 {offsets = [0, 0, 0], sizes = [2, 2, 64], strides = [1, 1, 1]} : vector<2x8x64xf32> to vector<2x2x64xf32>
    %cst = arith.constant dense<0.000000e+00> : vector<2x2xf32>
    %36 = vector.multi_reduction <add>, %35, %cst [2] : vector<2x2x64xf32> to vector<2x2xf32>
    %37 = vector.shape_cast %36 : vector<2x2xf32> to vector<2x2x1xf32>
    %38 = vector.extract_strided_slice %37 {offsets = [0, 0, 0], sizes = [2, 1, 1], strides = [1, 1, 1]} : vector<2x2x1xf32> to vector<2x1x1xf32>
    %39 = vector.extract_strided_slice %37 {offsets = [0, 1, 0], sizes = [2, 1, 1], strides = [1, 1, 1]} : vector<2x2x1xf32> to vector<2x1x1xf32>
    %40 = arith.addf %38, %39 : vector<2x1x1xf32>
    %cst_8 = arith.constant 7.812500e-03 : f32
    %41 = vector.broadcast %cst_8 : f32 to vector<2x1x1xf32>
    %42 = arith.mulf %40, %41 : vector<2x1x1xf32>
    %43 = vector.broadcast %42 : vector<2x1x1xf32> to vector<2x2x64xf32>
    %44 = arith.subf %35, %43 : vector<2x2x64xf32>
    %45 = arith.mulf %44, %44 : vector<2x2x64xf32>
    %cst_9 = arith.constant dense<0.000000e+00> : vector<2x2xf32>
    %46 = vector.multi_reduction <add>, %45, %cst_9 [2] : vector<2x2x64xf32> to vector<2x2xf32>
    %47 = vector.shape_cast %46 : vector<2x2xf32> to vector<2x2x1xf32>
    %48 = vector.extract_strided_slice %47 {offsets = [0, 0, 0], sizes = [2, 1, 1], strides = [1, 1, 1]} : vector<2x2x1xf32> to vector<2x1x1xf32>
    %49 = vector.extract_strided_slice %47 {offsets = [0, 1, 0], sizes = [2, 1, 1], strides = [1, 1, 1]} : vector<2x2x1xf32> to vector<2x1x1xf32>
    %50 = arith.addf %48, %49 : vector<2x1x1xf32>
    %cst_10 = arith.constant 7.812500e-03 : f32
    %51 = vector.broadcast %cst_10 : f32 to vector<2x1x1xf32>
    %52 = arith.mulf %50, %51 : vector<2x1x1xf32>
    %53 = vector.extract_strided_slice %3 {offsets = [0, 0], sizes = [2, 1], strides = [1, 1]} : vector<8x1xf32> to vector<2x1xf32>
    %54 = vector.shape_cast %53 : vector<2x1xf32> to vector<1x2x1xf32>
    %cst_11 = arith.constant 9.99999974E-6 : f32
    %55 = vector.broadcast %cst_11 : f32 to vector<2x1x1xf32>
    %56 = arith.addf %52, %55 : vector<2x1x1xf32>
    %57 = math.rsqrt %56 : vector<2x1x1xf32>
    %58 = vector.broadcast %54 : vector<1x2x1xf32> to vector<2x2x1xf32>
    %59 = vector.broadcast %57 : vector<2x1x1xf32> to vector<2x2x1xf32>
    %60 = arith.mulf %58, %59 : vector<2x2x1xf32>
    %61 = vector.broadcast %60 : vector<2x2x1xf32> to vector<2x2x64xf32>
    %62 = arith.mulf %44, %61 : vector<2x2x64xf32>
    %63 = vector.extract_strided_slice %4 {offsets = [0, 0], sizes = [2, 1], strides = [1, 1]} : vector<8x1xf32> to vector<2x1xf32>
    %64 = vector.shape_cast %63 : vector<2x1xf32> to vector<1x2x1xf32>
    %65 = vector.broadcast %64 : vector<1x2x1xf32> to vector<2x2x64xf32>
    %66 = arith.addf %62, %65 : vector<2x2x64xf32>
    %cst_12 = arith.constant 0.000000e+00 : f32
    %67 = vector.broadcast %cst_12 : f32 to vector<2x2x64xf32>
    %68 = arith.maximumf %66, %67 : vector<2x2x64xf32>
    %c0_13 = arith.constant 0 : index
    %c0_14 = arith.constant 0 : index
    %c0_15 = arith.constant 0 : index
    %69 = vector.load %arg4[%c0_13, %c0_14, %c0_15] : memref<2x8x64xf32, #tpu.memory_space<vmem>>, vector<2x2x64xf32>
    tpu.vector_store %arg4[%c0_13, %c0_14, %c0_15], %68 {strides = array<i32>} : memref<2x8x64xf32, #tpu.memory_space<vmem>>, vector<2x2x64xf32>,
    %70 = vector.extract_strided_slice %34 {offsets = [0, 2, 0], sizes = [2, 2, 64], strides = [1, 1, 1]} : vector<2x8x64xf32> to vector<2x2x64xf32>
    %cst_16 = arith.constant dense<0.000000e+00> : vector<2x2xf32>
    %71 = vector.multi_reduction <add>, %70, %cst_16 [2] : vector<2x2x64xf32> to vector<2x2xf32>
    %72 = vector.shape_cast %71 : vector<2x2xf32> to vector<2x2x1xf32>
    %73 = vector.extract_strided_slice %72 {offsets = [0, 0, 0], sizes = [2, 1, 1], strides = [1, 1, 1]} : vector<2x2x1xf32> to vector<2x1x1xf32>
    %74 = vector.extract_strided_slice %72 {offsets = [0, 1, 0], sizes = [2, 1, 1], strides = [1, 1, 1]} : vector<2x2x1xf32> to vector<2x1x1xf32>
    %75 = arith.addf %73, %74 : vector<2x1x1xf32>
    %cst_17 = arith.constant 7.812500e-03 : f32
    %76 = vector.broadcast %cst_17 : f32 to vector<2x1x1xf32>
    %77 = arith.mulf %75, %76 : vector<2x1x1xf32>
    %78 = vector.broadcast %77 : vector<2x1x1xf32> to vector<2x2x64xf32>
    %79 = arith.subf %70, %78 : vector<2x2x64xf32>
    %80 = arith.mulf %79, %79 : vector<2x2x64xf32>
    %cst_18 = arith.constant dense<0.000000e+00> : vector<2x2xf32>
    %81 = vector.multi_reduction <add>, %80, %cst_18 [2] : vector<2x2x64xf32> to vector<2x2xf32>
    %82 = vector.shape_cast %81 : vector<2x2xf32> to vector<2x2x1xf32>
    %83 = vector.extract_strided_slice %82 {offsets = [0, 0, 0], sizes = [2, 1, 1], strides = [1, 1, 1]} : vector<2x2x1xf32> to vector<2x1x1xf32>
    %84 = vector.extract_strided_slice %82 {offsets = [0, 1, 0], sizes = [2, 1, 1], strides = [1, 1, 1]} : vector<2x2x1xf32> to vector<2x1x1xf32>
    %85 = arith.addf %83, %84 : vector<2x1x1xf32>
    %cst_19 = arith.constant 7.812500e-03 : f32
    %86 = vector.broadcast %cst_19 : f32 to vector<2x1x1xf32>
    %87 = arith.mulf %85, %86 : vector<2x1x1xf32>
    %88 = vector.extract_strided_slice %3 {offsets = [2, 0], sizes = [2, 1], strides = [1, 1]} : vector<8x1xf32> to vector<2x1xf32>
    %89 = vector.shape_cast %88 : vector<2x1xf32> to vector<1x2x1xf32>
    %cst_20 = arith.constant 9.99999974E-6 : f32
    %90 = vector.broadcast %cst_20 : f32 to vector<2x1x1xf32>
    %91 = arith.addf %87, %90 : vector<2x1x1xf32>
    %92 = math.rsqrt %91 : vector<2x1x1xf32>
    %93 = vector.broadcast %89 : vector<1x2x1xf32> to vector<2x2x1xf32>
    %94 = vector.broadcast %92 : vector<2x1x1xf32> to vector<2x2x1xf32>
    %95 = arith.mulf %93, %94 : vector<2x2x1xf32>
    %96 = vector.broadcast %95 : vector<2x2x1xf32> to vector<2x2x64xf32>
    %97 = arith.mulf %79, %96 : vector<2x2x64xf32>
    %98 = vector.extract_strided_slice %4 {offsets = [2, 0], sizes = [2, 1], strides = [1, 1]} : vector<8x1xf32> to vector<2x1xf32>
    %99 = vector.shape_cast %98 : vector<2x1xf32> to vector<1x2x1xf32>
    %100 = vector.broadcast %99 : vector<1x2x1xf32> to vector<2x2x64xf32>
    %101 = arith.addf %97, %100 : vector<2x2x64xf32>
    %cst_21 = arith.constant 0.000000e+00 : f32
    %102 = vector.broadcast %cst_21 : f32 to vector<2x2x64xf32>
    %103 = arith.maximumf %101, %102 : vector<2x2x64xf32>
    %c0_22 = arith.constant 0 : index
    %c2_23 = arith.constant 2 : index
    %c0_24 = arith.constant 0 : index
    %104 = vector.load %arg4[%c0_22, %c2_23, %c0_24] : memref<2x8x64xf32, #tpu.memory_space<vmem>>, vector<2x2x64xf32>
    tpu.vector_store %arg4[%c0_22, %c2_23, %c0_24], %103 {strides = array<i32>} : memref<2x8x64xf32, #tpu.memory_space<vmem>>, vector<2x2x64xf32>,
    %105 = vector.extract_strided_slice %34 {offsets = [0, 4, 0], sizes = [2, 2, 64], strides = [1, 1, 1]} : vector<2x8x64xf32> to vector<2x2x64xf32>
    %cst_25 = arith.constant dense<0.000000e+00> : vector<2x2xf32>
    %106 = vector.multi_reduction <add>, %105, %cst_25 [2] : vector<2x2x64xf32> to vector<2x2xf32>
    %107 = vector.shape_cast %106 : vector<2x2xf32> to vector<2x2x1xf32>
    %108 = vector.extract_strided_slice %107 {offsets = [0, 0, 0], sizes = [2, 1, 1], strides = [1, 1, 1]} : vector<2x2x1xf32> to vector<2x1x1xf32>
    %109 = vector.extract_strided_slice %107 {offsets = [0, 1, 0], sizes = [2, 1, 1], strides = [1, 1, 1]} : vector<2x2x1xf32> to vector<2x1x1xf32>
    %110 = arith.addf %108, %109 : vector<2x1x1xf32>
    %cst_26 = arith.constant 7.812500e-03 : f32
    %111 = vector.broadcast %cst_26 : f32 to vector<2x1x1xf32>
    %112 = arith.mulf %110, %111 : vector<2x1x1xf32>
    %113 = vector.broadcast %112 : vector<2x1x1xf32> to vector<2x2x64xf32>
    %114 = arith.subf %105, %113 : vector<2x2x64xf32>
    %115 = arith.mulf %114, %114 : vector<2x2x64xf32>
    %cst_27 = arith.constant dense<0.000000e+00> : vector<2x2xf32>
    %116 = vector.multi_reduction <add>, %115, %cst_27 [2] : vector<2x2x64xf32> to vector<2x2xf32>
    %117 = vector.shape_cast %116 : vector<2x2xf32> to vector<2x2x1xf32>
    %118 = vector.extract_strided_slice %117 {offsets = [0, 0, 0], sizes = [2, 1, 1], strides = [1, 1, 1]} : vector<2x2x1xf32> to vector<2x1x1xf32>
    %119 = vector.extract_strided_slice %117 {offsets = [0, 1, 0], sizes = [2, 1, 1], strides = [1, 1, 1]} : vector<2x2x1xf32> to vector<2x1x1xf32>
    %120 = arith.addf %118, %119 : vector<2x1x1xf32>
    %cst_28 = arith.constant 7.812500e-03 : f32
    %121 = vector.broadcast %cst_28 : f32 to vector<2x1x1xf32>
    %122 = arith.mulf %120, %121 : vector<2x1x1xf32>
    %123 = vector.extract_strided_slice %3 {offsets = [4, 0], sizes = [2, 1], strides = [1, 1]} : vector<8x1xf32> to vector<2x1xf32>
    %124 = vector.shape_cast %123 : vector<2x1xf32> to vector<1x2x1xf32>
    %cst_29 = arith.constant 9.99999974E-6 : f32
    %125 = vector.broadcast %cst_29 : f32 to vector<2x1x1xf32>
    %126 = arith.addf %122, %125 : vector<2x1x1xf32>
    %127 = math.rsqrt %126 : vector<2x1x1xf32>
    %128 = vector.broadcast %124 : vector<1x2x1xf32> to vector<2x2x1xf32>
    %129 = vector.broadcast %127 : vector<2x1x1xf32> to vector<2x2x1xf32>
    %130 = arith.mulf %128, %129 : vector<2x2x1xf32>
    %131 = vector.broadcast %130 : vector<2x2x1xf32> to vector<2x2x64xf32>
    %132 = arith.mulf %114, %131 : vector<2x2x64xf32>
    %133 = vector.extract_strided_slice %4 {offsets = [4, 0], sizes = [2, 1], strides = [1, 1]} : vector<8x1xf32> to vector<2x1xf32>
    %134 = vector.shape_cast %133 : vector<2x1xf32> to vector<1x2x1xf32>
    %135 = vector.broadcast %134 : vector<1x2x1xf32> to vector<2x2x64xf32>
    %136 = arith.addf %132, %135 : vector<2x2x64xf32>
    %cst_30 = arith.constant 0.000000e+00 : f32
    %137 = vector.broadcast %cst_30 : f32 to vector<2x2x64xf32>
    %138 = arith.maximumf %136, %137 : vector<2x2x64xf32>
    %c0_31 = arith.constant 0 : index
    %c4 = arith.constant 4 : index
    %c0_32 = arith.constant 0 : index
    %139 = vector.load %arg4[%c0_31, %c4, %c0_32] : memref<2x8x64xf32, #tpu.memory_space<vmem>>, vector<2x2x64xf32>
    tpu.vector_store %arg4[%c0_31, %c4, %c0_32], %138 {strides = array<i32>} : memref<2x8x64xf32, #tpu.memory_space<vmem>>, vector<2x2x64xf32>,
    %140 = vector.extract_strided_slice %34 {offsets = [0, 6, 0], sizes = [2, 2, 64], strides = [1, 1, 1]} : vector<2x8x64xf32> to vector<2x2x64xf32>
    %cst_33 = arith.constant dense<0.000000e+00> : vector<2x2xf32>
    %141 = vector.multi_reduction <add>, %140, %cst_33 [2] : vector<2x2x64xf32> to vector<2x2xf32>
    %142 = vector.shape_cast %141 : vector<2x2xf32> to vector<2x2x1xf32>
    %143 = vector.extract_strided_slice %142 {offsets = [0, 0, 0], sizes = [2, 1, 1], strides = [1, 1, 1]} : vector<2x2x1xf32> to vector<2x1x1xf32>
    %144 = vector.extract_strided_slice %142 {offsets = [0, 1, 0], sizes = [2, 1, 1], strides = [1, 1, 1]} : vector<2x2x1xf32> to vector<2x1x1xf32>
    %145 = arith.addf %143, %144 : vector<2x1x1xf32>
    %cst_34 = arith.constant 7.812500e-03 : f32
    %146 = vector.broadcast %cst_34 : f32 to vector<2x1x1xf32>
    %147 = arith.mulf %145, %146 : vector<2x1x1xf32>
    %148 = vector.broadcast %147 : vector<2x1x1xf32> to vector<2x2x64xf32>
    %149 = arith.subf %140, %148 : vector<2x2x64xf32>
    %150 = arith.mulf %149, %149 : vector<2x2x64xf32>
    %cst_35 = arith.constant dense<0.000000e+00> : vector<2x2xf32>
    %151 = vector.multi_reduction <add>, %150, %cst_35 [2] : vector<2x2x64xf32> to vector<2x2xf32>
    %152 = vector.shape_cast %151 : vector<2x2xf32> to vector<2x2x1xf32>
    %153 = vector.extract_strided_slice %152 {offsets = [0, 0, 0], sizes = [2, 1, 1], strides = [1, 1, 1]} : vector<2x2x1xf32> to vector<2x1x1xf32>
    %154 = vector.extract_strided_slice %152 {offsets = [0, 1, 0], sizes = [2, 1, 1], strides = [1, 1, 1]} : vector<2x2x1xf32> to vector<2x1x1xf32>
    %155 = arith.addf %153, %154 : vector<2x1x1xf32>
    %cst_36 = arith.constant 7.812500e-03 : f32
    %156 = vector.broadcast %cst_36 : f32 to vector<2x1x1xf32>
    %157 = arith.mulf %155, %156 : vector<2x1x1xf32>
    %158 = vector.extract_strided_slice %3 {offsets = [6, 0], sizes = [2, 1], strides = [1, 1]} : vector<8x1xf32> to vector<2x1xf32>
    %159 = vector.shape_cast %158 : vector<2x1xf32> to vector<1x2x1xf32>
    %cst_37 = arith.constant 9.99999974E-6 : f32
    %160 = vector.broadcast %cst_37 : f32 to vector<2x1x1xf32>
    %161 = arith.addf %157, %160 : vector<2x1x1xf32>
    %162 = math.rsqrt %161 : vector<2x1x1xf32>
    %163 = vector.broadcast %159 : vector<1x2x1xf32> to vector<2x2x1xf32>
    %164 = vector.broadcast %162 : vector<2x1x1xf32> to vector<2x2x1xf32>
    %165 = arith.mulf %163, %164 : vector<2x2x1xf32>
    %166 = vector.broadcast %165 : vector<2x2x1xf32> to vector<2x2x64xf32>
    %167 = arith.mulf %149, %166 : vector<2x2x64xf32>
    %168 = vector.extract_strided_slice %4 {offsets = [6, 0], sizes = [2, 1], strides = [1, 1]} : vector<8x1xf32> to vector<2x1xf32>
    %169 = vector.shape_cast %168 : vector<2x1xf32> to vector<1x2x1xf32>
    %170 = vector.broadcast %169 : vector<1x2x1xf32> to vector<2x2x64xf32>
    %171 = arith.addf %167, %170 : vector<2x2x64xf32>
    %cst_38 = arith.constant 0.000000e+00 : f32
    %172 = vector.broadcast %cst_38 : f32 to vector<2x2x64xf32>
    %173 = arith.maximumf %171, %172 : vector<2x2x64xf32>
    %c0_39 = arith.constant 0 : index
    %c6 = arith.constant 6 : index
    %c0_40 = arith.constant 0 : index
    %174 = vector.load %arg4[%c0_39, %c6, %c0_40] : memref<2x8x64xf32, #tpu.memory_space<vmem>>, vector<2x2x64xf32>
    tpu.vector_store %arg4[%c0_39, %c6, %c0_40], %173 {strides = array<i32>} : memref<2x8x64xf32, #tpu.memory_space<vmem>>, vector<2x2x64xf32>,
    return
  }
  func.func @transform_0(%arg0: i32) -> (i32, i32, i32) {
    %c0_i32 = arith.constant 0 : i32
    %c0_i32_0 = arith.constant 0 : i32
    %c0_i32_1 = arith.constant 0 : i32
    return %arg0, %c0_i32, %c0_i32_0 : i32, i32, i32
  }
  func.func @transform_1(%arg0: i32) -> (i32, i32) {
    %c0_i32 = arith.constant 0 : i32
    %c0_i32_0 = arith.constant 0 : i32
    %c0_i32_1 = arith.constant 0 : i32
    return %c0_i32, %c0_i32_0 : i32, i32
  }
  func.func @transform_2(%arg0: i32) -> (i32, i32) {
    %c0_i32 = arith.constant 0 : i32
    %c0_i32_0 = arith.constant 0 : i32
    %c0_i32_1 = arith.constant 0 : i32
    return %c0_i32, %c0_i32_0 : i32, i32
  }
  func.func @transform_3(%arg0: i32) -> (i32, i32, i32) {
    %c0_i32 = arith.constant 0 : i32
    %c0_i32_0 = arith.constant 0 : i32
    %c0_i32_1 = arith.constant 0 : i32
    return %arg0, %c0_i32, %c0_i32_0 : i32, i32, i32
  }
}

</mosaic_0001>

<bundles_post_ra>
// kernel: unet_grid_gating_signal.1
= control target key start
LH: loop header
LB: loop body
LE: loop exit
PB: predicated region body
PF: predicated region fallthrough
CT: control target
= control target key end

     0   :  { %s751_s12 = smov 0   ;;  %s915_s0 = inlined_call_operand.vmem [shape: f32[4,4,64], index: 0, kind: input, shape index: {}]   ;;  %s916_s1 = inlined_call_operand.vmem [shape: f32[8,4], index: 1, kind: input, shape index: {}]   ;;  %s917_s2 = inlined_call_operand.vmem [shape: f32[8,3], index: 2, kind: input, shape index: {}]   ;;  %s918_s3 = inlined_call_operand.vmem [shape: f32[4,8,64], index: 3, kind: output, shape index: {}]  }
   0x1 LB: > { %s654_s13 = sadd.s32 4294967295, %s724_s12   ;;  %p658_p0 = scmp.ge.s32.totalorder %s724_s12, 1  ;;  %s724_s12 = sphi %s751_s12, %s13_s12  }
   0x2   : > { %p138_p1 = scmp.lt.s32.totalorder %s724_s12, 3 }
   0x4   : > { %p139_p2 = pnand %p658_p0, %p138_p1 }
   0x5   : > { %v176_v0 = vld [vmem:[%s916_s1] sm:$0xff] (!%p139_p2)  ;;  %v726_v1 = vmov (!%p139_p2), 2   ;;  %v727_v2 = vmov (!%p139_p2), 0   ;;  %v728_v3 = vmov (!%p139_p2), 3   ;;  %v729_v4 = vmov (!%p139_p2), 1   ;;  %s659_s18 = sshll.u32 (!%p139_p2), %s654_s13, 1 }
   0x6   : > { %142 = sbr.rel (%p139_p2) target bundleno = 804 (0x324), region = 32  ;;  %696 = vset.pattern.permute.xlu1 (!%p139_p2), %v726_v1  ;;  %694 = vset.pattern.permute.xlu0 (!%p139_p2), %v727_v2  ;;  %v766_v5 = vld [vmem:[%s917_s2] sm:$0xff] (!%p139_p2)  ;;  %p163_p3 = scmp.lt.s32.totalorder (!%p139_p2), %s659_s18, 3  ;;  %v183_v6 = vlaneseq (!%p139_p2)  ;;  %vm337_vm0 = vcmask (!%p139_p2), 519170   ;;  %vm511_vm1 = vcmask (!%p139_p2), 523270   ;;  %vm424_vm2 = vcmask (!%p139_p2), 521220  }
   0x7   : > { %208 = vperm.xlu1 (!%p139_p2), %696, %v176_v0   ;;  %180 = vperm.xlu0 (!%p139_p2), %694, %v176_v0   ;;  %vm248_vm3 = vcmask (!%p139_p2), 517120   ;;  %s730_s4 = smov (!%p139_p2), 1  }
   0x8   : > { %v773_v7 = vshrl.u32 (!%p139_p2), %v183_v6, 7 }
   0xa   : > { %v779_v8 = vsub.s32 (!%p139_p2), 2, %v773_v7  ;;  %v782_v9 = vsub.s32 (!%p139_p2), 0, %v773_v7  ;;  %v227_v12 = vsub.s32 (!%p139_p2), 3, %v773_v7  ;;  %v199_v13 = vsub.s32 (!%p139_p2), 1, %v773_v7 }
   0xb   : > { %697 = vset.pattern.permute.xlu1 (!%p139_p2), %v728_v3  ;;  %695 = vset.pattern.permute.xlu0 (!%p139_p2), %v729_v4 }
   0xc   : > { %222 = vperm.xlu1 (!%p139_p2), %697, %v176_v0   ;;  %194 = vperm.xlu0 (!%p139_p2), %695, %v176_v0  }
   0xd   : > { %s920_s18 = smov (!%p163_p3, %s659_s18), 3 }
   0xe   : > { %s660_s19 = sshll.u32 %s920_s18, 2  ;;  %s662_s5 = sshll.u32 %s920_s18, 3 }
   0xf   : > { %s166_s22 = scalar_lea.vmem %s915_s0, %s660_s19  ;;  %s887_s8 = scalar_lea.vmem %s918_s3, %s662_s5 }
  0x10   : > { %698 = vset.pattern.permute.xlu1 %v727_v2  ;;  %699 = vset.pattern.permute.xlu0 %v726_v1  ;;  %v174_v10 = vld [vmem:[%s166_s22] sm:$0xf]  ;;  %v175_v11 = vld [vmem:[%s166_s22 + $0x4] sm:$0xf] }
  0x11   : > { %243 = vperm.xlu1 %698, %v766_v5   ;;  %v214_v16 = vrot.slane %v174_v10, %v779_v8  ;;  %v218_v17 = vrot.slane %v175_v11, %v779_v8  ;;  %v186_v18 = vrot.slane %v174_v10, %v782_v9  ;;  %v190_v19 = vrot.slane %v175_v11, %v782_v9 }
  0x12   : > { %v228_v20 = vrot.slane %v174_v10, %v227_v12  ;;  %v232_v21 = vrot.slane %v175_v11, %v227_v12  ;;  %v200_v22 = vrot.slane %v174_v10, %v199_v13  ;;  %v204_v23 = vrot.slane %v175_v11, %v199_v13 }
  0x15   : > { %701 = vset.pattern.permute.xlu1 %v729_v4 }
  0x86   : > { %v209_v14 = vpop.permute.xlu1 %208  ;;  %v181_v15 = vpop.permute.xlu0 %180 }
  0x87   : > { %v219_v24 = vmul.f32 %v214_v16, %v209_v14  ;;  %v220_v25 = vmul.f32 %v218_v17, %v209_v14  ;;  %v191_v26 = vmul.f32 %v186_v18, %v181_v15  ;;  %v192_v27 = vmul.f32 %v190_v19, %v181_v15 }
  0x8b   : > { %v223_v28 = vpop.permute.xlu1 %222  ;;  %v195_v29 = vpop.permute.xlu0 %194 }
  0x8c   : > { %v233_v30 = vmul.f32 %v228_v20, %v223_v28  ;;  %v234_v31 = vmul.f32 %v232_v21, %v223_v28  ;;  %v205_v32 = vmul.f32 %v200_v22, %v195_v29  ;;  %v206_v33 = vmul.f32 %v204_v23, %v195_v29 }
  0x8e   : > { %v237_v34 = vadd.f32 %v233_v30, %v219_v24  ;;  %v238_v35 = vadd.f32 %v234_v31, %v220_v25  ;;  %v235_v36 = vadd.f32 %v205_v32, %v191_v26  ;;  %v236_v37 = vadd.f32 %v206_v33, %v192_v27 }
  0x90   : > { %v244_v38 = vpop.permute.xlu1 %243  ;;  %v239_v39 = vadd.f32 %v237_v34, %v235_v36  ;;  %v240_v40 = vadd.f32 %v238_v35, %v236_v37 }
  0x92   : > { %v790_v41 = vadd.f32 %v244_v38, %v239_v39  ;;  %v792_v42 = vadd.f32 %v244_v38, %v240_v40 }
  0x94   : > { %v341_v43 = vsel %vm337_vm0, %v792_v42, 0.0  ;;  %v338_v44 = vsel %vm337_vm0, %v790_v41, 0.0  ;;  %v512_v45 = vsel %vm511_vm1, %v790_v41, 0.0  ;;  %v425_v46 = vsel %vm424_vm2, %v790_v41, 0.0 }
  0x95   : > { %342 = vadd.xlane.f32.xlu1 %v341_v43  ;;  %339 = vadd.xlane.f32.xlu0 %v338_v44  ;;  %v428_v47 = vsel %vm424_vm2, %v792_v42, 0.0  ;;  %v249_v48 = vsel %vm248_vm3, %v790_v41, 0.0  ;;  %v515_v49 = vsel %vm511_vm1, %v792_v42, 0.0  ;;  %v252_v50 = vsel %vm248_vm3, %v792_v42, 0.0 }
  0x99   : > { %513 = vadd.xlane.f32.xlu1 %v512_v45  ;;  %426 = vadd.xlane.f32.xlu0 %v425_v46 }
  0x9d   : > { %429 = vadd.xlane.f32.xlu0 %v428_v47  ;;  %250 = vadd.xlane.f32.xlu1 %v249_v48 }
  0xa1   : > { %516 = vadd.xlane.f32.xlu0 %v515_v49 }
  0xa5   : > { %253 = vadd.xlane.f32.xlu0 %v252_v50 }
 0x122   : > { %v343_v51 = vpop.xlane.xlu1 %342  ;;  %v340_v52 = vpop.xlane.xlu0 %339 }
 0x123   : > { %v346_v58 = vrot.slane %v340_v52, 1  ;;  %v347_v59 = vrot.slane %v343_v51, 1 }
 0x125   : > { %v350_v1 = vadd.f32 %v346_v58, %v340_v52  ;;  %v351_v3 = vadd.f32 %v347_v59, %v343_v51 }
 0x126   : > { %v514_v53 = vpop.xlane.xlu1 %513  ;;  %v427_v54 = vpop.xlane.xlu0 %426 }
 0x127   : > { %v433_v61 = vrot.slane %v427_v54, 1  ;;  %v520_v2 = vrot.slane %v514_v53, 1  ;;  %v352_v15 = vmul.f32 0.0078125, %v350_v1  ;;  %v353_v18 = vmul.f32 0.0078125, %v351_v3 }
 0x129   : > { %v437_v10 = vadd.f32 %v433_v61, %v427_v54  ;;  %v524_v14 = vadd.f32 %v520_v2, %v514_v53  ;;  %v356_v22 = vrot.slane %v352_v15, 2  ;;  %v357_v24 = vrot.slane %v353_v18, 2 }
 0x12a   : > { %v430_v55 = vpop.xlane.xlu0 %429  ;;  %v251_v56 = vpop.xlane.xlu1 %250 }
 0x12b   : > { %v257_v57 = vrot.slane %v251_v56, 1  ;;  %v434_v63 = vrot.slane %v430_v55, 1  ;;  %v439_v19 = vmul.f32 0.0078125, %v437_v10  ;;  %v526_v23 = vmul.f32 0.0078125, %v524_v14 }
 0x12d   : > { %v261_v60 = vadd.f32 %v257_v57, %v251_v56  ;;  %v438_v12 = vadd.f32 %v434_v63, %v430_v55  ;;  %v443_v26 = vrot.slane %v439_v19, 4  ;;  %v530_v28 = vrot.slane %v526_v23, 6 }
 0x12e   : > { %v517_v62 = vpop.xlane.xlu0 %516 }
 0x12f   : > { %v263_v0 = vmul.f32 0.0078125, %v261_v60  ;;  %v521_v6 = vrot.slane %v517_v62, 1  ;;  %v440_v21 = vmul.f32 0.0078125, %v438_v12 }
 0x131   : > { %665 = vpush %v263_v0  ;;  %v525_v16 = vadd.f32 %v521_v6, %v517_v62  ;;  %v444_v27 = vrot.slane %v440_v21, 4 }
 0x132   : > { %v254_v11 = vpop.xlane.xlu0 %253 }
 0x133   : > { %v258_v13 = vrot.slane %v254_v11, 1  ;;  %v527_v25 = vmul.f32 0.0078125, %v525_v16 }
 0x135   : > { %v262_v17 = vadd.f32 %v258_v13, %v254_v11  ;;  %v531_v29 = vrot.slane %v527_v25, 6 }
 0x137   : > { %v264_v20 = vmul.f32 0.0078125, %v262_v17 }
 0x139   : > { %667 = vpush %v264_v20 }
 0x13a   : > { %669 = vpush %v356_v22 }
 0x13b   : > { %671 = vpush %v357_v24 }
 0x13c   : > { %673 = vpush %v443_v26 }
 0x13d   : > { %675 = vpush %v444_v27 }
 0x13e   : > { %677 = vpush %v530_v28 }
 0x13f   : > { %679 = vpush %v531_v29 }
 0x162   : > { %s666_s23 = spop %665 }
 0x163   : > { %v267_v30 = vstv %s666_s23 }
 0x164   : > { %v811_v31 = vsub.f32 %v790_v41, %v267_v30 }
 0x166   : > { %v275_v32 = vmul.f32 %v811_v31, %v811_v31 }
 0x168   : > { %v277_v33 = vsel %vm248_vm3, %v275_v32, 0.0 }
 0x169   : > { %278 = vadd.xlane.f32.xlu1 %v277_v33 }
 0x16a   : > { %s668_s24 = spop %667 }
 0x16b   : > { %v271_v34 = vstv %s668_s24  ;;  %s670_s25 = spop %669 }
 0x16c   : > { %v817_v35 = vsub.f32 %v792_v42, %v271_v34  ;;  %v359_v36 = vstv %s670_s25  ;;  %s672_s26 = spop %671 }
 0x16d   : > { %v820_v37 = vsub.f32 %v790_v41, %v359_v36  ;;  %s674_s27 = spop %673  ;;  %v362_v38 = vstv %s672_s26 }
 0x16e   : > { %v446_v39 = vstv %s674_s27  ;;  %s676_s28 = spop %675  ;;  %v276_v40 = vmul.f32 %v817_v35, %v817_v35  ;;  %v834_v49 = vsub.f32 %v792_v42, %v362_v38 }
 0x16f   : > { %v825_v43 = vsub.f32 %v790_v41, %v446_v39  ;;  %v449_v44 = vstv %s676_s28  ;;  %s678_s29 = spop %677  ;;  %v366_v45 = vmul.f32 %v820_v37, %v820_v37 }
 0x170   : > { %v830_v46 = vsub.f32 %v792_v42, %v449_v44  ;;  %v533_v47 = vstv %s678_s29  ;;  %s680_s30 = spop %679  ;;  %v280_v48 = vsel %vm248_vm3, %v276_v40, 0.0  ;;  %v367_v58 = vmul.f32 %v834_v49, %v834_v49 }
 0x171   : > { %v837_v50 = vsub.f32 %v790_v41, %v533_v47  ;;  %v368_v51 = vsel %vm337_vm0, %v366_v45, 0.0  ;;  %281 = vadd.xlane.f32.xlu1 %v280_v48  ;;  %v453_v52 = vmul.f32 %v825_v43, %v825_v43  ;;  %v536_v53 = vstv %s680_s30 }
 0x172   : > { %369 = vadd.xlane.f32.xlu0 %v368_v51  ;;  %v454_v56 = vmul.f32 %v830_v46, %v830_v46  ;;  %v848_v57 = vsub.f32 %v792_v42, %v536_v53  ;;  %v371_v60 = vsel %vm337_vm0, %v367_v58, 0.0 }
 0x173   : > { %v540_v54 = vmul.f32 %v837_v50, %v837_v50  ;;  %v455_v55 = vsel %vm424_vm2, %v453_v52, 0.0 }
 0x174   : > { %v458_v59 = vsel %vm424_vm2, %v454_v56, 0.0  ;;  %v541_v61 = vmul.f32 %v848_v57, %v848_v57  ;;  %v477_v56 = vsub.s32 4, %v773_v7 }
 0x175   : > { %v542_v41 = vsel %vm511_vm1, %v540_v54, 0.0  ;;  %456 = vadd.xlane.f32.xlu1 %v455_v55 }
 0x176   : > { %543 = vadd.xlane.f32.xlu0 %v542_v41  ;;  %v545_v62 = vsel %vm511_vm1, %v541_v61, 0.0  ;;  %v564_v61 = vsub.s32 6, %v773_v7 }
 0x179   : > { %459 = vadd.xlane.f32.xlu1 %v458_v59 }
 0x17a   : > { %372 = vadd.xlane.f32.xlu0 %v371_v60 }
 0x17e   : > { %546 = vadd.xlane.f32.xlu0 %v545_v62 }
 0x1f6   : > { %v279_v42 = vpop.xlane.xlu1 %278 }
 0x1f7   : > { %v285_v63 = vrot.slane %v279_v42, 1 }
 0x1f9   : > { %v289_v0 = vadd.f32 %v285_v63, %v279_v42 }
 0x1fb   : > { %v291_v1 = vmul.f32 0.0078125, %v289_v0 }
 0x1fd   : > { %v293_v2 = vadd.f32 1e-05, %v291_v1 }
 0x1fe   : > { %v282_v3 = vpop.xlane.xlu1 %281 }
 0x1ff   : > { %702 = vrsqrt.f32 %v293_v2  ;;  %v370_v6 = vpop.xlane.xlu0 %369  ;;  %v286_v10 = vrot.slane %v282_v3, 1 }
 0x200   : > { %v376_v11 = vrot.slane %v370_v6, 1 }
 0x201   : > { %v290_v12 = vadd.f32 %v286_v10, %v282_v3 }
 0x202   : > { %v380_v13 = vadd.f32 %v376_v11, %v370_v6  ;;  %v457_v14 = vpop.xlane.xlu1 %456 }
 0x203   : > { %v292_v15 = vmul.f32 0.0078125, %v290_v12  ;;  %v544_v16 = vpop.xlane.xlu0 %543  ;;  %v463_v17 = vrot.slane %v457_v14, 1 }
 0x204   : > { %v382_v18 = vmul.f32 0.0078125, %v380_v13  ;;  %v550_v19 = vrot.slane %v544_v16, 1 }
 0x205   : > { %v294_v20 = vadd.f32 1e-05, %v292_v15  ;;  %v467_v21 = vadd.f32 %v463_v17, %v457_v14 }
 0x206   : > { %v384_v22 = vadd.f32 1e-05, %v382_v18  ;;  %v554_v23 = vadd.f32 %v550_v19, %v544_v16  ;;  %v460_v24 = vpop.xlane.xlu1 %459 }
 0x207   : > { %704 = vrsqrt.f32 %v294_v20  ;;  %v469_v25 = vmul.f32 0.0078125, %v467_v21  ;;  %v373_v26 = vpop.xlane.xlu0 %372  ;;  %v464_v27 = vrot.slane %v460_v24, 1 }
 0x208   : > { %v556_v28 = vmul.f32 0.0078125, %v554_v23  ;;  %v377_v29 = vrot.slane %v373_v26, 1  ;;  %706 = vrsqrt.f32 %v384_v22 }
 0x209   : > { %v703_v30 = vpop.eup %702  ;;  %v471_v32 = vadd.f32 1e-05, %v469_v25  ;;  %v468_v33 = vadd.f32 %v464_v27, %v460_v24 }
 0x20a   : > { %v558_v34 = vadd.f32 1e-05, %v556_v28  ;;  %v381_v36 = vadd.f32 %v377_v29, %v373_v26  ;;  %v300_v38 = vrot.slane %v703_v30, %v782_v9 }
 0x20b   : > { %708 = vrsqrt.f32 %v471_v32  ;;  %v470_v39 = vmul.f32 0.0078125, %v468_v33  ;;  %v547_v40 = vpop.xlane.xlu0 %546 }
 0x20c   : > { %v383_v44 = vmul.f32 0.0078125, %v381_v36  ;;  %v551_v45 = vrot.slane %v547_v40, 1  ;;  %307 = vrot.lane.b32.xlu1 %v300_v38, %s730_s4  ;;  %710 = vrsqrt.f32 %v558_v34 }
 0x20d   : > { %v472_v47 = vadd.f32 1e-05, %v470_v39 }
 0x20e   : > { %v385_v48 = vadd.f32 1e-05, %v383_v44  ;;  %v555_v51 = vadd.f32 %v551_v45, %v547_v40 }
 0x20f   : > { %712 = vrsqrt.f32 %v472_v47 }
 0x210   : > { %v557_v52 = vmul.f32 0.0078125, %v555_v51  ;;  %714 = vrsqrt.f32 %v385_v48 }
 0x211   : > { %v705_v53 = vpop.eup %704 }
 0x212   : > { %v559_v54 = vadd.f32 1e-05, %v557_v52  ;;  %v304_v55 = vrot.slane %v705_v53, %v782_v9  ;;  %v707_v41 = vpop.eup %706 }
 0x213   : > { %v391_v59 = vrot.slane %v707_v41, %v779_v8 }
 0x214   : > { %309 = vrot.lane.b32.xlu0 %v304_v55, %s730_s4  ;;  %716 = vrsqrt.f32 %v559_v54 }
 0x215   : > { %v709_v58 = vpop.eup %708 }
 0x216   : > { %v478_v60 = vrot.slane %v709_v58, %v477_v56  ;;  %v711_v62 = vpop.eup %710 }
 0x217   : > { %v565_v63 = vrot.slane %v711_v62, %v564_v61 }
 0x218   : > { %398 = vrot.lane.b32.xlu0 %v391_v59, %s730_s4  ;;  %485 = vrot.lane.b32.xlu1 %v478_v60, %s730_s4 }
 0x219   : > { %v713_v42 = vpop.eup %712 }
 0x21a   : > { %v482_v9 = vrot.slane %v713_v42, %v477_v56  ;;  %v715_v0 = vpop.eup %714 }
 0x21b   : > { %v395_v1 = vrot.slane %v715_v0, %v779_v8 }
 0x21c   : > { %572 = vrot.lane.b32.xlu1 %v565_v63, %s730_s4  ;;  %487 = vrot.lane.b32.xlu0 %v482_v9, %s730_s4 }
 0x21e   : > { %v717_v2 = vpop.eup %716 }
 0x21f   : > { %v569_v7 = vrot.slane %v717_v2, %v564_v61 }
 0x220   : > { %400 = vrot.lane.b32.xlu1 %v395_v1, %s730_s4  ;;  %328 = vperm.xlu0 %699, %v766_v5  }
 0x224   : > { %574 = vrot.lane.b32.xlu1 %v569_v7, %s730_s4  ;;  %700 = vset.pattern.permute.xlu0 %v729_v4 }
 0x27e   : > { %v308_v3 = vpop.permute.xlu1 %307 }
 0x27f   : > { %v313_v6 = vmul.f32 %v308_v3, %v766_v5 }
 0x281   : > { %317 = vperm.xlu0 %700, %v313_v6  }
 0x286   : > { %v310_v10 = vpop.permute.xlu0 %309 }
 0x287   : > { %v314_v11 = vmul.f32 %v310_v10, %v766_v5 }
 0x289   : > { %322 = vperm.xlu1 %701, %v314_v11  }
 0x28a   : > { %v399_v12 = vpop.permute.xlu0 %398  ;;  %v486_v8 = vpop.permute.xlu1 %485 }
 0x28b   : > { %v404_v13 = vmul.f32 %v399_v12, %v766_v5  ;;  %v491_v14 = vmul.f32 %v486_v8, %v766_v5 }
 0x28d   : > { %408 = vperm.xlu1 %701, %v404_v13   ;;  %495 = vperm.xlu0 %700, %v491_v14  }
 0x28e   : > { %v573_v15 = vpop.permute.xlu1 %572  ;;  %v488_v17 = vpop.permute.xlu0 %487 }
 0x28f   : > { %v492_v19 = vmul.f32 %v488_v17, %v766_v5  ;;  %v578_v21 = vmul.f32 %v573_v15, %v766_v5 }
 0x292   : > { %v401_v16 = vpop.permute.xlu1 %400 }
 0x293   : > { %v405_v4 = vmul.f32 %v401_v16, %v766_v5 }
 0x295   : > { %413 = vperm.xlu1 %701, %v405_v4  }
 0x296   : > { %v575_v18 = vpop.permute.xlu1 %574 }
 0x297   : > { %v579_v20 = vmul.f32 %v575_v18, %v766_v5 }
 0x299   : > { %500 = vperm.xlu1 %701, %v492_v19   ;;  %587 = vperm.xlu0 %700, %v579_v20  }
 0x29d   : > { %582 = vperm.xlu1 %701, %v578_v21  }
 0x29f   : > { %v329_v22 = vpop.permute.xlu0 %328 }
 0x300   : > { %v318_v23 = vpop.permute.xlu0 %317 }
 0x301   : > { %v325_v24 = vmul.f32 %v318_v23, %v811_v31 }
 0x303   : > { %v331_v25 = vadd.f32 %v329_v22, %v325_v24 }
 0x305   : > { %v333_v26 = vmax.f32 %v331_v25, 0.0 }
 0x307   : > { %335 = vst.msk [vmem:[%s887_s8] sm:$0x3] %vm248_vm3, %v333_v26 }
 0x308   : > { %v323_v5 = vpop.permute.xlu1 %322 }
 0x309   : > { %v326_v27 = vmul.f32 %v323_v5, %v817_v35 }
 0x30b   : > { %v332_v28 = vadd.f32 %v329_v22, %v326_v27 }
 0x30c   : > { %v496_v29 = vpop.permute.xlu0 %495  ;;  %v409_v30 = vpop.permute.xlu1 %408 }
 0x30d   : > { %v334_v31 = vmax.f32 %v332_v28, 0.0  ;;  %v503_v32 = vmul.f32 %v496_v29, %v825_v43  ;;  %v416_v33 = vmul.f32 %v409_v30, %v820_v37 }
 0x30f   : > { %336 = vst.msk [vmem:[%s887_s8 + $0x8] sm:$0x3] %vm248_vm3, %v334_v31  ;;  %v505_v34 = vadd.f32 %v503_v32, %v329_v22  ;;  %v418_v36 = vadd.f32 %v416_v33, %v329_v22 }
 0x311   : > { %v507_v38 = vmax.f32 %v505_v34, 0.0  ;;  %v420_v39 = vmax.f32 %v418_v36, 0.0 }
 0x313   : > { %509 = vst.msk [vmem:[%s887_s8] sm:$0x30] %vm424_vm2, %v507_v38 }
 0x314   : > { %422 = vst.msk [vmem:[%s887_s8] sm:$0xc] %vm337_vm0, %v420_v39  ;;  %v414_v35 = vpop.permute.xlu1 %413 }
 0x315   : > { %v417_v40 = vmul.f32 %v414_v35, %v834_v49 }
 0x317   : > { %v419_v44 = vadd.f32 %v417_v40, %v329_v22 }
 0x318   : > { %v588_v43 = vpop.permute.xlu0 %587  ;;  %v501_v37 = vpop.permute.xlu1 %500 }
 0x319   : > { %v421_v45 = vmax.f32 %v419_v44, 0.0  ;;  %v504_v47 = vmul.f32 %v501_v37, %v830_v46  ;;  %v591_v48 = vmul.f32 %v588_v43, %v848_v57 }
 0x31b   : > { %423 = vst.msk [vmem:[%s887_s8 + $0x8] sm:$0xc] %vm337_vm0, %v421_v45  ;;  %v506_v51 = vadd.f32 %v504_v47, %v329_v22  ;;  %v593_v55 = vadd.f32 %v591_v48, %v329_v22 }
 0x31c   : > { %v583_v52 = vpop.permute.xlu1 %582 }
 0x31d   : > { %v508_v53 = vmax.f32 %v506_v51, 0.0  ;;  %v590_v54 = vmul.f32 %v583_v52, %v837_v50  ;;  %v595_v41 = vmax.f32 %v593_v55, 0.0 }
 0x31f   : > { %510 = vst.msk [vmem:[%s887_s8 + $0x8] sm:$0x30] %vm424_vm2, %v508_v53  ;;  %v592_v49 = vadd.f32 %v590_v54, %v329_v22 }
 0x320   : > { %597 = vst.msk [vmem:[%s887_s8 + $0x8] sm:$0xc0] %vm511_vm1, %v595_v41 }
 0x321   : > { %v594_v56 = vmax.f32 %v592_v49, 0.0 }
 0x323   : > { %596 = vst.msk [vmem:[%s887_s8] sm:$0xc0] %vm511_vm1, %v594_v56 }
 0x324 PF: > { %s13_s12 = sadd.s32 1, %s724_s12  }
 0x325   : > { %p10_p4 = scmp.ge.s32.totalorder %s13_s12, 4  }
 0x327   :  { %12 = sbr.rel (!%p10_p4) target bundleno = 1 (0x1), region = 62 }

</bundles_post_ra>
